<compile_context>
chip_gen: v7x
topology: tpu7x:2x2x1
jax: 0.10.0
libtpu: 0.0.40
codegen_flags: <defaults>
</compile_context>

<pallas_src>
import functools

import numpy as np
import jax
import jax.numpy as jnp
from jax import lax
from jax.experimental import pallas as pl
from jax.experimental.pallas import tpu as pltpu


# -----------------------------------------------------------------------------
# Host-side: Beta inverse CDF (replaces scipy.stats.beta.ppf). Deterministic.
# -----------------------------------------------------------------------------
def _beta22_ppf(p):
    """Inverse CDF of Beta(2, 2): F(x) = 3x^2 - 2x^3, inverted by bisection."""
    p = np.asarray(p, np.float64)
    lo = np.zeros_like(p)
    hi = np.ones_like(p)
    for _ in range(80):
        mid = 0.5 * (lo + hi)
        cdf = mid * mid * (3.0 - 2.0 * mid)
        lo = np.where(cdf < p, mid, lo)
        hi = np.where(cdf < p, hi, mid)
    return 0.5 * (lo + hi)


def _beta_ppf_numeric(p, a, b, n_grid=200001):
    """Deterministic numpy replacement for scipy.stats.beta.ppf for general a, b."""
    # TODO(synk): trapezoid CDF inversion loses accuracy near 0/1 when a < 1 or b < 1.
    p = np.asarray(p, np.float64)
    x = np.linspace(0.0, 1.0, n_grid)
    with np.errstate(divide="ignore", invalid="ignore"):
        pdf = np.power(x, a - 1.0) * np.power(1.0 - x, b - 1.0)
    pdf = np.where(np.isfinite(pdf), pdf, 0.0)
    cdf = np.concatenate([[0.0], np.cumsum(0.5 * (pdf[1:] + pdf[:-1]) * np.diff(x))])
    cdf = cdf / cdf[-1]
    return np.interp(p, cdf, x)


def _make_rand_dist(P, beta_a, beta_b, ortho_constraint):
    grid = np.arange(1.0, 2 * P, 2.0).astype(np.float64) / (2 * P)
    if float(beta_a) == 2.0 and float(beta_b) == 2.0:
        q = _beta22_ppf(grid)
    else:
        q = _beta_ppf_numeric(grid, float(beta_a), float(beta_b))
    rd = q * 2.0 - 1.0
    if ortho_constraint:
        rd = np.maximum(rd, 0.0)
    return jnp.asarray(rd, jnp.float32).reshape(1, P)


# -----------------------------------------------------------------------------
# Sizing helpers (per-generation VMEM budget, K-chunk, finalize strip rows).
# -----------------------------------------------------------------------------
def _round_up(n, m):
    return ((n + m - 1) // m) * m


def _vmem_capacity_bytes():
    try:
        cap = int(pltpu.get_tpu_info().vmem_capacity_bytes)
        if cap > 0:
            return cap
    except Exception:
        pass
    return 128 * 1024 * 1024


def _choose_tk(d, target, P, vmem_limit):
    """Largest K-chunk <= target that is a multiple of 128 and divides d, else d.

    The feature dim sits on the 128-lane axis, so anything that is not a
    multiple of 128 must be the full dim.  Also bound the double-buffered
    (2, P, tk) f32 x block to ~1/4 of the VMEM budget.
    """
    budget = max(128, vmem_limit // (64 * max(P, 1)))   # 2 halves * 4B * 2 bufs * P
    tgt = max(128, min(int(target), budget))
    if d <= tgt:
        return d
    t = (tgt // 128) * 128
    while t >= 128:
        if d % t == 0:
            return t
        t -= 128
    return d   # block == full feature dim is always legal


def _choose_strip_rows(P_pad, requested=None, budget_bytes=2 * 1024 * 1024):
    """Rows per finalize strip: multiple of 8, divides P_pad, bounded working set."""
    if requested is None:
        rows = budget_bytes // (16 * max(_round_up(P_pad, 128), 128))
    else:
        rows = int(requested)
    rows = max(8, (rows // 8) * 8)
    rows = min(rows, P_pad)
    while P_pad % rows:
        rows -= 8
    return int(rows)


def _vmem_estimate_bytes(P, P_pad, tk, Dv, lacc, strip_rows):
    """Counts all live pieces: blocks, accumulators, column scratch, strip tiles."""
    lanes_p = _round_up(P, 128)
    b = 2 * (2 * P_pad * _round_up(tk, 128) * 4)        # x block, double-buffered
    b += 1 * (2 * P_pad * _round_up(Dv, 128) * 4)       # v block, resident (Buffered(1))
    b += 8 * lanes_p * 4                                 # rand_dist row
    b += 3 * P_pad * _round_up(lacc, 128) * 4            # partial-sum accumulators
    b += 2 * P_pad * 128 * 4                             # d / hash column scratch
    b += 8 * _round_up(strip_rows, 8) * lanes_p * 4      # live strip-loop tiles
    b += 4 * P_pad * 128 * 4                             # finalize column temporaries
    return int(b)


# -----------------------------------------------------------------------------
# Pallas kernel.
#   Natural layout (no host transpose):
#     x_ref    : (2, P, tk)  K-chunk of original features; [0]=first half, [1]=second
#     v_ref    : (2, P, Dv)  hash outputs, resident across the K grid
#     rand_ref : (1, P)      Beta quantiles, sorted ascending (pair rank -> quantile)
#     o_ref    : (1, 1)      scalar loss, SMEM
#   Scratch: three (P, lacc) partial-sum accumulators, two (P_pad, 1) columns
#   (orig-distance, hash-distance) staged for the strip-tiled rank loop.
# -----------------------------------------------------------------------------
def _sdc_loss_kernel(x_ref, v_ref, rand_ref, o_ref,
                     num_acc, sxa_acc, sxb_acc, d_col_ref, h_col_ref,
                     *, rec, quan, quan_type, P, P_pad, strip_rows, lacc):
    k = pl.program_id(0)
    nk = pl.num_programs(0)
    tk = x_ref.shape[2]

    @pl.when(k == 0)
    def _init():
        num_acc[...] = jnp.zeros_like(num_acc)
        sxa_acc[...] = jnp.zeros_like(sxa_acc)
        sxb_acc[...] = jnp.zeros_like(sxb_acc)

    # ---- hot loop: fold this K-chunk into per-pair partial sums (VPU only) ----
    if lacc == 128:
        # feature chunk is lane-aligned: 128-wide vreg adds, no XLU reduce here.
        for c in range(tk // 128):
            sl = slice(c * 128, (c + 1) * 128)
            xa_c = x_ref[0, :, sl]
            xb_c = x_ref[1, :, sl]
            num_acc[...] += xa_c * xb_c
            sxa_acc[...] += xa_c * xa_c
            sxb_acc[...] += xb_c * xb_c
    else:
        # tk == Dx < 128 (or odd): single direct add, lane reduce deferred to finalize.
        xa = x_ref[0]
        xb = x_ref[1]
        num_acc[...] += xa * xb
        sxa_acc[...] += xa * xa
        sxb_acc[...] += xb * xb

    # ---- finalize: rank / gather / losses, strip-tiled over pairs ----
    @pl.when(k == nk - 1)
    def _finalize():
        eps2 = jnp.float32(1e-8) * jnp.float32(1e-8)

        def _cos_cols(num, sa, sb):
            # num / max(||a||*||b||, eps) == num * rsqrt(max(||a||^2*||b||^2, eps^2))
            return num * lax.rsqrt(jnp.maximum(sa * sb, eps2))

        # cosine of the original features per pair, pairs on sublanes: (P, 1)
        num = jnp.sum(num_acc[...], axis=1, keepdims=True)
        sxa = jnp.sum(sxa_acc[...], axis=1, keepdims=True)
        sxb = jnp.sum(sxb_acc[...], axis=1, keepdims=True)
        orig_d = _cos_cols(num, sxa, sxb)                               # (P, 1)

        # hash cosine per pair; forward-identical for (a,b) and (b,a) -> one cos.
        va = v_ref[0]                                                   # (P, Dv)
        vb = v_ref[1]
        hash_ab = _cos_cols(jnp.sum(va * vb, axis=1, keepdims=True),
                            jnp.sum(va * va, axis=1, keepdims=True),
                            jnp.sum(vb * vb, axis=1, keepdims=True))   # (P, 1)

        # Stage the per-pair columns in VMEM so the strip loop can pl.ds them.
        # Sublane tail (if any) is padded with +inf / 0 so the ranks of real
        # pairs are unaffected and padded rows contribute nothing.
        if P_pad == P:
            d_col_ref[...] = orig_d
            h_col_ref[...] = hash_ab
        else:
            d_col_ref[:P, :] = orig_d
            h_col_ref[:P, :] = hash_ab
            d_col_ref[P:, :] = jnp.full((P_pad - P, 1), jnp.inf, jnp.float32)
            h_col_ref[P:, :] = jnp.zeros((P_pad - P, 1), jnp.float32)

        # Row (lane-axis) views used against every strip: only real pairs.
        d_row = jnp.transpose(orig_d)                                   # (1, P)
        idx_row = lax.broadcasted_iota(jnp.int32, (1, P), 1)            # (1, P)
        rand_row = rand_ref[...]                                        # (1, P)

        n_strips = P_pad // strip_rows

        def strip_body(s, acc):
            off = pl.multiple_of(s * strip_rows, 8)
            d_i = d_col_ref[pl.ds(off, strip_rows), :]                  # (strip, 1)
            h_i = h_col_ref[pl.ds(off, strip_rows), :]                  # (strip, 1)
            idx_i = lax.broadcasted_iota(jnp.int32, (strip_rows, 1), 0) + off
            # j sorts before i  <=>  d[j] < d[i], or tie and j < i (stable sort).
            cmp = (d_row < d_i) | ((d_row == d_i) & (idx_row < idx_i))  # (strip, P)
            rank = jnp.sum(cmp.astype(jnp.float32), axis=1,
                           keepdims=True).astype(jnp.int32)             # (strip, 1)
            # rand_dist[rank]: exact VPU select + lane reduce (no one-hot matmul).
            rf = jnp.sum(jnp.where(idx_row == rank, rand_row, 0.0),
                         axis=1, keepdims=True)                          # (strip, 1)
            contrib = jnp.where(idx_i < P, jnp.maximum(h_i - rf, 0.0), 0.0)
            return acc + jnp.sum(contrib, keepdims=True)                 # (1, 1)

        init = jnp.zeros((1, 1), jnp.float32)
        if n_strips <= 8:
            loss_rec_sum = lax.fori_loop(0, n_strips, strip_body, init, unroll=True)
        else:
            loss_rec_sum = lax.fori_loop(0, n_strips, strip_body, init)
        loss_rec = loss_rec_sum * (1.0 / P)                              # (1, 1)

        total = rec * loss_rec

        if quan != 0.0:
            if quan_type == "cs":
                def _one_minus_cos_sum(m):
                    s = jnp.sign(m)
                    c = _cos_cols(jnp.sum(m * s, axis=1, keepdims=True),
                                  jnp.sum(m * m, axis=1, keepdims=True),
                                  jnp.sum(s * s, axis=1, keepdims=True))
                    return jnp.sum(1.0 - c, keepdims=True)
                loss_quan = (_one_minus_cos_sum(va)
                             + _one_minus_cos_sum(vb)) * (1.0 / (2 * P))
            else:
                dv = va.shape[1]

                def _elem_sum(m):
                    d = m - jnp.sign(m)
                    if quan_type == "l1":
                        t = jnp.abs(d)
                    elif quan_type == "l2":
                        t = d * d
                    else:
                        t = jnp.abs(d * d * d)
                    return jnp.sum(t, keepdims=True)
                loss_quan = (_elem_sum(va) + _elem_sum(vb)) * (1.0 / (2 * P * dv))
            total = total + quan * loss_quan

        o_ref[0, 0] = total[0, 0]


# -----------------------------------------------------------------------------
# Wrapper
# -----------------------------------------------------------------------------
def sdc_loss(x, v, *, rec=1.0, quan=0.0, quan_type="cs",
             beta_ab=2.0, beta_a=-1.0, beta_b=-1.0,
             ortho_constraint=True, block_k=None, finalize_strip_rows=None):
    x = jnp.asarray(x, jnp.float32)
    v = jnp.asarray(v, jnp.float32)

    B = x.shape[0]
    if B % 2 != 0:                 # drop the last sample, like the torch module
        x = x[:-1]
        v = v[:-1]
        B -= 1
    P = B // 2
    Dx = x.shape[1]
    Dv = v.shape[1]
    assert P < (1 << 24), "ranks accumulate in f32; exact only for P < 2**24"

    if beta_a == -1 and beta_b == -1:
        beta_a = beta_b = beta_ab
    elif beta_a == -1 or beta_b == -1:
        raise ValueError("set beta_a AND beta_b to have non negative values")

    rand_dist = _make_rand_dist(P, beta_a, beta_b, ortho_constraint)   # (1, P)

    # Natural (pair, feature) layout: no host-side transpose.  The pair halves
    # are exposed as a leading axis of size 2 via a free reshape, so x and v are
    # each read from HBM exactly once by the kernel's pipelined DMA.
    x3 = x.reshape(2, P, Dx)
    v3 = v.reshape(2, P, Dv)

    # Per-generation sizing: VMEM ceiling with headroom, K-chunk target.
    vmem_cap = _vmem_capacity_bytes()
    vmem_limit = max(32 * 1024 * 1024, (vmem_cap * 7) // 8)
    if block_k is None:
        block_k = 256 if vmem_cap <= 64 * 1024 * 1024 else 768   # v7x vs v5e/v6e

    tk = _choose_tk(Dx, block_k, P, vmem_limit)
    lacc = 128 if tk % 128 == 0 else tk
    P_pad = _round_up(P, 8)
    strip_rows = _choose_strip_rows(P_pad, finalize_strip_rows)

    # Shrink the K-chunk if the full working set would not leave headroom.
    while tk > 128 and _vmem_estimate_bytes(P, P_pad, tk, Dv, lacc,
                                            strip_rows) > (vmem_limit * 3) // 4:
        nt = _choose_tk(Dx, tk - 128, P, vmem_limit)
        if nt >= tk:
            break
        tk = nt
        lacc = 128 if tk % 128 == 0 else tk
    nk = Dx // tk

    kernel = functools.partial(_sdc_loss_kernel,
                               rec=float(rec), quan=float(quan),
                               quan_type=str(quan_type),
                               P=P, P_pad=P_pad, strip_rows=strip_rows, lacc=lacc)

    grid_spec = pltpu.PrefetchScalarGridSpec(
        num_scalar_prefetch=0,
        grid=(nk,),
        in_specs=[
            # streamed original-feature K-chunks (double-buffered by default)
            pl.BlockSpec((2, P, tk), lambda k: (0, 0, k)),
            # resident hash outputs / Beta quantiles: single-buffered
            pl.BlockSpec((2, P, Dv), lambda k: (0, 0, 0),
                         pipeline_mode=pl.Buffered(1)),
            pl.BlockSpec((1, P), lambda k: (0, 0),
                         pipeline_mode=pl.Buffered(1)),
        ],
        # scalar loss lives in SMEM -- no padded (8,128) VMEM output tile
        out_specs=pl.BlockSpec(memory_space=pltpu.MemorySpace.SMEM),
        scratch_shapes=[
            pltpu.VMEM((P, lacc), jnp.float32),     # <xa, xb> partial sums
            pltpu.VMEM((P, lacc), jnp.float32),     # ||xa||^2 partial sums
            pltpu.VMEM((P, lacc), jnp.float32),     # ||xb||^2 partial sums
            pltpu.VMEM((P_pad, 1), jnp.float32),    # orig cosine column (padded)
            pltpu.VMEM((P_pad, 1), jnp.float32),    # hash cosine column (padded)
        ],
    )

    out = pl.pallas_call(
        kernel,
        out_shape=jax.ShapeDtypeStruct((1, 1), jnp.float32),
        grid_spec=grid_spec,
        compiler_params=pltpu.CompilerParams(
            dimension_semantics=("arbitrary",),     # K axis is a reduction
            vmem_limit_bytes=int(vmem_limit),
        ),
    )(x3, v3, rand_dist)
    return out[0, 0]


# -----------------------------------------------------------------------------
# Pure-JAX reference (mirrors the torch forward) for a sanity check.
# -----------------------------------------------------------------------------
def _ref_sdc_loss(x, v, rand_dist, rec, quan, quan_type="cs"):
    B = x.shape[0]
    P = B // 2

    def cos(a, b):
        num = jnp.sum(a * b, -1)
        na = jnp.sqrt(jnp.sum(a * a, -1))
        nb = jnp.sqrt(jnp.sum(b * b, -1))
        return num / jnp.maximum(na * nb, 1e-8)

    hab = cos(v[:P], v[P:])
    hba = cos(v[P:], v[:P])
    od = cos(x[:P], x[P:])
    idx = jnp.argsort(od)
    hab = hab[idx]
    hba = hba[idx]
    rd = jnp.reshape(rand_dist, (-1,))
    lrec = 0.5 * jnp.mean(jnp.maximum(hab - rd, 0.0)) \
         + 0.5 * jnp.mean(jnp.maximum(hba - rd, 0.0))
    if quan_type == "cs":
        lq = jnp.mean(1.0 - cos(v, jnp.sign(v)))
    else:
        d = v - jnp.sign(v)
        if quan_type == "l1":
            lq = jnp.mean(jnp.abs(d))
        elif quan_type == "l2":
            lq = jnp.mean(d * d)
        else:
            lq = jnp.mean(jnp.abs(d ** 3))
    return rec * lrec + quan * lq


if __name__ == "__main__":
    key = jax.random.PRNGKey(0)
    kx, kv, kx2, kv2 = jax.random.split(key, 4)

    # Case A: tiny shapes -- single K step, feature dim narrower than a lane
    # tile, pair count below one sublane group (exercises the padded finalize).
    B, Dx, Dv = 8, 32, 16
    x = jax.random.normal(kx, (B, Dx), dtype=jnp.float32)
    v = jax.random.normal(kv, (B, Dv), dtype=jnp.float32)
    rand_vec_a = _make_rand_dist(B // 2, 2.0, 2.0, True)

    cases = [
        (1.0, 0.0, "cs"),            # module defaults
        (1.0, 0.5, "cs"),
        (1.0, 0.5, "l2"),
        (0.7, 0.3, "l1"),
        (1.0, 0.5, "l3"),
    ]
    for rec, quan, qtype in cases:
        loss = jax.block_until_ready(
            sdc_loss(x, v, rec=rec, quan=quan, quan_type=qtype))
        ref = _ref_sdc_loss(x, v, rand_vec_a, rec, quan, qtype)
        np.testing.assert_allclose(np.asarray(loss), np.asarray(ref),
                                   rtol=1e-4, atol=1e-5)

    # Case B: multi-step K grid with lane-aligned 128-wide chunks and a
    # multi-strip finalize loop (strip_rows=8 forces 2 strips at P=16).
    B2, Dx2, Dv2 = 32, 256, 32
    x2 = jax.random.normal(kx2, (B2, Dx2), dtype=jnp.float32)
    v2 = jax.random.normal(kv2, (B2, Dv2), dtype=jnp.float32)
    rand_vec_b = _make_rand_dist(B2 // 2, 2.0, 2.0, True)
    loss2 = jax.block_until_ready(
        sdc_loss(x2, v2, rec=1.0, quan=0.25, quan_type="cs",
                 block_k=128, finalize_strip_rows=8))
    ref2 = _ref_sdc_loss(x2, v2, rand_vec_b, 1.0, 0.25, "cs")
    np.testing.assert_allclose(np.asarray(loss2), np.asarray(ref2),
                               rtol=1e-4, atol=1e-5)

    print("KERNEL_OK")
</pallas_src>

<mosaic_0001>
module attributes {stable_mosaic.version = 11 : i64} {
  func.func @_sdc_loss_kernel(%arg0: i32, %arg1: memref<2x4x32xf32, #tpu.memory_space<vmem>>, %arg2: memref<2x4x16xf32, #tpu.memory_space<vmem>>, %arg3: memref<1x4xf32, #tpu.memory_space<vmem>>, %arg4: memref<1x1xf32, #tpu.memory_space<smem>>, %arg5: memref<4x32xf32, #tpu.memory_space<vmem>>, %arg6: memref<4x32xf32, #tpu.memory_space<vmem>>, %arg7: memref<4x32xf32, #tpu.memory_space<vmem>>, %arg8: memref<8x1xf32, #tpu.memory_space<vmem>>, %arg9: memref<8x1xf32, #tpu.memory_space<vmem>>) attributes {dimension_semantics = [#tpu.dimension_semantics<arbitrary>], iteration_bounds = array<i64: 1>, scalar_prefetch = 0 : i64, scratch_operands = 5 : i64, tpu.core_type = #tpu.core_type<tc>, window_params = [{transform_indices = @transform_0, window_bounds = array<i64: 2, 4, 32>}, {pipeline_mode = #tpu.pipeline_mode<synchronous>, transform_indices = @transform_1, window_bounds = array<i64: 2, 4, 16>}, {pipeline_mode = #tpu.pipeline_mode<synchronous>, transform_indices = @transform_2, window_bounds = array<i64: 1, 4>}, {transform_indices = @transform_3, window_bounds = array<i64: 1, 1>}]} {
    %c0_i32 = arith.constant 0 : i32
    %0 = arith.cmpi eq, %arg0, %c0_i32 : i32
    %1 = arith.extui %0 : i1 to i32
    %c0_i32_0 = arith.constant 0 : i32
    %2 = arith.cmpi ne, %1, %c0_i32_0 : i32
    scf.if %2 {
      %cst = arith.constant 0.000000e+00 : f32
      %22 = vector.broadcast %cst : f32 to vector<4x32xf32>
      %c0_19 = arith.constant 0 : index
      %c0_20 = arith.constant 0 : index
      %23 = vector.load %arg5[%c0_19, %c0_20] : memref<4x32xf32, #tpu.memory_space<vmem>>, vector<4x32xf32>
      tpu.vector_store %arg5[%c0_19, %c0_20], %22 {strides = array<i32>} : memref<4x32xf32, #tpu.memory_space<vmem>>, vector<4x32xf32>,
      %cst_21 = arith.constant 0.000000e+00 : f32
      %24 = vector.broadcast %cst_21 : f32 to vector<4x32xf32>
      %c0_22 = arith.constant 0 : index
      %c0_23 = arith.constant 0 : index
      %25 = vector.load %arg6[%c0_22, %c0_23] : memref<4x32xf32, #tpu.memory_space<vmem>>, vector<4x32xf32>
      tpu.vector_store %arg6[%c0_22, %c0_23], %24 {strides = array<i32>} : memref<4x32xf32, #tpu.memory_space<vmem>>, vector<4x32xf32>,
      %cst_24 = arith.constant 0.000000e+00 : f32
      %26 = vector.broadcast %cst_24 : f32 to vector<4x32xf32>
      %c0_25 = arith.constant 0 : index
      %c0_26 = arith.constant 0 : index
      %27 = vector.load %arg7[%c0_25, %c0_26] : memref<4x32xf32, #tpu.memory_space<vmem>>, vector<4x32xf32>
      tpu.vector_store %arg7[%c0_25, %c0_26], %26 {strides = array<i32>} : memref<4x32xf32, #tpu.memory_space<vmem>>, vector<4x32xf32>,
    } else {
    }
    %c0 = arith.constant 0 : index
    %c0_1 = arith.constant 0 : index
    %c0_2 = arith.constant 0 : index
    %3 = vector.load %arg1[%c0, %c0_1, %c0_2] : memref<2x4x32xf32, #tpu.memory_space<vmem>>, vector<1x4x32xf32>
    %4 = vector.shape_cast %3 : vector<1x4x32xf32> to vector<4x32xf32>
    %c1 = arith.constant 1 : index
    %c0_3 = arith.constant 0 : index
    %c0_4 = arith.constant 0 : index
    %5 = vector.load %arg1[%c1, %c0_3, %c0_4] : memref<2x4x32xf32, #tpu.memory_space<vmem>>, vector<1x4x32xf32>
    %6 = vector.shape_cast %5 : vector<1x4x32xf32> to vector<4x32xf32>
    %c0_5 = arith.constant 0 : index
    %c0_6 = arith.constant 0 : index
    %7 = vector.load %arg5[%c0_5, %c0_6] : memref<4x32xf32, #tpu.memory_space<vmem>>, vector<4x32xf32>
    %8 = arith.mulf %4, %6 : vector<4x32xf32>
    %9 = arith.addf %7, %8 : vector<4x32xf32>
    %c0_7 = arith.constant 0 : index
    %c0_8 = arith.constant 0 : index
    %10 = vector.load %arg5[%c0_7, %c0_8] : memref<4x32xf32, #tpu.memory_space<vmem>>, vector<4x32xf32>
    tpu.vector_store %arg5[%c0_7, %c0_8], %9 {strides = array<i32>} : memref<4x32xf32, #tpu.memory_space<vmem>>, vector<4x32xf32>,
    %c0_9 = arith.constant 0 : index
    %c0_10 = arith.constant 0 : index
    %11 = vector.load %arg6[%c0_9, %c0_10] : memref<4x32xf32, #tpu.memory_space<vmem>>, vector<4x32xf32>
    %12 = arith.mulf %4, %4 : vector<4x32xf32>
    %13 = arith.addf %11, %12 : vector<4x32xf32>
    %c0_11 = arith.constant 0 : index
    %c0_12 = arith.constant 0 : index
    %14 = vector.load %arg6[%c0_11, %c0_12] : memref<4x32xf32, #tpu.memory_space<vmem>>, vector<4x32xf32>
    tpu.vector_store %arg6[%c0_11, %c0_12], %13 {strides = array<i32>} : memref<4x32xf32, #tpu.memory_space<vmem>>, vector<4x32xf32>,
    %c0_13 = arith.constant 0 : index
    %c0_14 = arith.constant 0 : index
    %15 = vector.load %arg7[%c0_13, %c0_14] : memref<4x32xf32, #tpu.memory_space<vmem>>, vector<4x32xf32>
    %16 = arith.mulf %6, %6 : vector<4x32xf32>
    %17 = arith.addf %15, %16 : vector<4x32xf32>
    %c0_15 = arith.constant 0 : index
    %c0_16 = arith.constant 0 : index
    %18 = vector.load %arg7[%c0_15, %c0_16] : memref<4x32xf32, #tpu.memory_space<vmem>>, vector<4x32xf32>
    tpu.vector_store %arg7[%c0_15, %c0_16], %17 {strides = array<i32>} : memref<4x32xf32, #tpu.memory_space<vmem>>, vector<4x32xf32>,
    %c0_i32_17 = arith.constant 0 : i32
    %19 = arith.cmpi eq, %arg0, %c0_i32_17 : i32
    %20 = arith.extui %19 : i1 to i32
    %c0_i32_18 = arith.constant 0 : i32
    %21 = arith.cmpi ne, %20, %c0_i32_18 : i32
    scf.if %21 {
      %cst = arith.constant 9.99999993E-9 : f32
      %cst_19 = arith.constant 9.99999993E-9 : f32
      %22 = arith.mulf %cst, %cst_19 : f32
      %c0_20 = arith.constant 0 : index
      %c0_21 = arith.constant 0 : index
      %23 = vector.load %arg5[%c0_20, %c0_21] : memref<4x32xf32, #tpu.memory_space<vmem>>, vector<4x32xf32>
      %cst_22 = arith.constant dense<0.000000e+00> : vector<4xf32>
      %24 = vector.multi_reduction <add>, %23, %cst_22 [1] : vector<4x32xf32> to vector<4xf32>
      %25 = vector.shape_cast %24 : vector<4xf32> to vector<4x1xf32>
      %c0_23 = arith.constant 0 : index
      %c0_24 = arith.constant 0 : index
      %26 = vector.load %arg6[%c0_23, %c0_24] : memref<4x32xf32, #tpu.memory_space<vmem>>, vector<4x32xf32>
      %cst_25 = arith.constant dense<0.000000e+00> : vector<4xf32>
      %27 = vector.multi_reduction <add>, %26, %cst_25 [1] : vector<4x32xf32> to vector<4xf32>
      %28 = vector.shape_cast %27 : vector<4xf32> to vector<4x1xf32>
      %c0_26 = arith.constant 0 : index
      %c0_27 = arith.constant 0 : index
      %29 = vector.load %arg7[%c0_26, %c0_27] : memref<4x32xf32, #tpu.memory_space<vmem>>, vector<4x32xf32>
      %cst_28 = arith.constant dense<0.000000e+00> : vector<4xf32>
      %30 = vector.multi_reduction <add>, %29, %cst_28 [1] : vector<4x32xf32> to vector<4xf32>
      %31 = vector.shape_cast %30 : vector<4xf32> to vector<4x1xf32>
      %32 = arith.mulf %28, %31 : vector<4x1xf32>
      %33 = vector.broadcast %22 : f32 to vector<4x1xf32>
      %34 = arith.maximumf %32, %33 : vector<4x1xf32>
      %35 = math.rsqrt %34 : vector<4x1xf32>
      %36 = arith.mulf %25, %35 : vector<4x1xf32>
      %c0_29 = arith.constant 0 : index
      %c0_30 = arith.constant 0 : index
      %c0_31 = arith.constant 0 : index
      %37 = vector.load %arg2[%c0_29, %c0_30, %c0_31] : memref<2x4x16xf32, #tpu.memory_space<vmem>>, vector<1x4x16xf32>
      %38 = vector.shape_cast %37 : vector<1x4x16xf32> to vector<4x16xf32>
      %c1_32 = arith.constant 1 : index
      %c0_33 = arith.constant 0 : index
      %c0_34 = arith.constant 0 : index
      %39 = vector.load %arg2[%c1_32, %c0_33, %c0_34] : memref<2x4x16xf32, #tpu.memory_space<vmem>>, vector<1x4x16xf32>
      %40 = vector.shape_cast %39 : vector<1x4x16xf32> to vector<4x16xf32>
      %41 = arith.mulf %38, %40 : vector<4x16xf32>
      %cst_35 = arith.constant dense<0.000000e+00> : vector<4xf32>
      %42 = vector.multi_reduction <add>, %41, %cst_35 [1] : vector<4x16xf32> to vector<4xf32>
      %43 = vector.shape_cast %42 : vector<4xf32> to vector<4x1xf32>
      %44 = arith.mulf %38, %38 : vector<4x16xf32>
      %cst_36 = arith.constant dense<0.000000e+00> : vector<4xf32>
      %45 = vector.multi_reduction <add>, %44, %cst_36 [1] : vector<4x16xf32> to vector<4xf32>
      %46 = vector.shape_cast %45 : vector<4xf32> to vector<4x1xf32>
      %47 = arith.mulf %40, %40 : vector<4x16xf32>
      %cst_37 = arith.constant dense<0.000000e+00> : vector<4xf32>
      %48 = vector.multi_reduction <add>, %47, %cst_37 [1] : vector<4x16xf32> to vector<4xf32>
      %49 = vector.shape_cast %48 : vector<4xf32> to vector<4x1xf32>
      %50 = arith.mulf %46, %49 : vector<4x1xf32>
      %51 = vector.broadcast %22 : f32 to vector<4x1xf32>
      %52 = arith.maximumf %50, %51 : vector<4x1xf32>
      %53 = math.rsqrt %52 : vector<4x1xf32>
      %54 = arith.mulf %43, %53 : vector<4x1xf32>
      %c0_38 = arith.constant 0 : index
      %c0_39 = arith.constant 0 : index
      %55 = vector.load %arg8[%c0_38, %c0_39] : memref<8x1xf32, #tpu.memory_space<vmem>>, vector<4x1xf32>
      tpu.vector_store %arg8[%c0_38, %c0_39], %36 {strides = array<i32>} : memref<8x1xf32, #tpu.memory_space<vmem>>, vector<4x1xf32>,
      %c0_40 = arith.constant 0 : index
      %c0_41 = arith.constant 0 : index
      %56 = vector.load %arg9[%c0_40, %c0_41] : memref<8x1xf32, #tpu.memory_space<vmem>>, vector<4x1xf32>
      tpu.vector_store %arg9[%c0_40, %c0_41], %54 {strides = array<i32>} : memref<8x1xf32, #tpu.memory_space<vmem>>, vector<4x1xf32>,
      %cst_42 = arith.constant 0x7F800000 : f32
      %57 = vector.broadcast %cst_42 : f32 to vector<4x1xf32>
      %c4 = arith.constant 4 : index
      %c0_43 = arith.constant 0 : index
      %58 = vector.load %arg8[%c4, %c0_43] : memref<8x1xf32, #tpu.memory_space<vmem>>, vector<4x1xf32>
      tpu.vector_store %arg8[%c4, %c0_43], %57 {strides = array<i32>} : memref<8x1xf32, #tpu.memory_space<vmem>>, vector<4x1xf32>,
      %cst_44 = arith.constant 0.000000e+00 : f32
      %59 = vector.broadcast %cst_44 : f32 to vector<4x1xf32>
      %c4_45 = arith.constant 4 : index
      %c0_46 = arith.constant 0 : index
      %60 = vector.load %arg9[%c4_45, %c0_46] : memref<8x1xf32, #tpu.memory_space<vmem>>, vector<4x1xf32>
      tpu.vector_store %arg9[%c4_45, %c0_46], %59 {strides = array<i32>} : memref<8x1xf32, #tpu.memory_space<vmem>>, vector<4x1xf32>,
      %61 = tpu.transpose %36, [1, 0] : vector<4x1xf32> -> vector<1x4xf32>
      %62 = tpu.iota {dimensions = array<i32: 1>} : vector<1x4xi32>
      %c0_47 = arith.constant 0 : index
      %c0_48 = arith.constant 0 : index
      %63 = vector.load %arg3[%c0_47, %c0_48] : memref<1x4xf32, #tpu.memory_space<vmem>>, vector<1x4xf32>
      %cst_49 = arith.constant 0.000000e+00 : f32
      %64 = vector.broadcast %cst_49 : f32 to vector<1x1xf32>
      %c0_i32_50 = arith.constant 0 : i32
      %c8_i32 = arith.constant 8 : i32
      %65 = arith.muli %c0_i32_50, %c8_i32 : i32
      %66 = tpu.assume_multiple %65, 8 : i32
      %67 = arith.index_cast %66 : i32 to index
      %c0_51 = arith.constant 0 : index
      %68 = vector.load %arg8[%67, %c0_51] : memref<8x1xf32, #tpu.memory_space<vmem>>, vector<8x1xf32>
      %69 = arith.index_cast %66 : i32 to index
      %c0_52 = arith.constant 0 : index
      %70 = vector.load %arg9[%69, %c0_52] : memref<8x1xf32, #tpu.memory_space<vmem>>, vector<8x1xf32>
      %71 = tpu.iota {dimensions = array<i32: 0>} : vector<8x1xi32>
      %72 = vector.broadcast %66 : i32 to vector<8x1xi32>
      %73 = arith.addi %71, %72 : vector<8x1xi32>
      %74 = vector.broadcast %61 : vector<1x4xf32> to vector<8x4xf32>
      %75 = vector.broadcast %68 : vector<8x1xf32> to vector<8x4xf32>
      %76 = arith.cmpf olt, %74, %75 : vector<8x4xf32>
      %77 = vector.broadcast %61 : vector<1x4xf32> to vector<8x4xf32>
      %78 = vector.broadcast %68 : vector<8x1xf32> to vector<8x4xf32>
      %79 = arith.cmpf oeq, %77, %78 : vector<8x4xf32>
      %80 = vector.broadcast %62 : vector<1x4xi32> to vector<8x4xi32>
      %81 = vector.broadcast %73 : vector<8x1xi32> to vector<8x4xi32>
      %82 = arith.cmpi slt, %80, %81 : vector<8x4xi32>
      %83 = arith.andi %79, %82 : vector<8x4xi1>
      %84 = arith.ori %76, %83 : vector<8x4xi1>
      %85 = arith.extui %84 : vector<8x4xi1> to vector<8x4xi32>
      %86 = arith.sitofp %85 : vector<8x4xi32> to vector<8x4xf32>
      %cst_53 = arith.constant dense<0.000000e+00> : vector<8xf32>
      %87 = vector.multi_reduction <add>, %86, %cst_53 [1] : vector<8x4xf32> to vector<8xf32>
      %88 = vector.shape_cast %87 : vector<8xf32> to vector<8x1xf32>
      %89 = arith.fptosi %88 : vector<8x1xf32> to vector<8x1xi32>
      %90 = vector.broadcast %62 : vector<1x4xi32> to vector<8x4xi32>
      %91 = vector.broadcast %89 : vector<8x1xi32> to vector<8x4xi32>
      %92 = arith.cmpi eq, %90, %91 : vector<8x4xi32>
      %cst_54 = arith.constant 0.000000e+00 : f32
      %93 = vector.shape_cast %63 : vector<1x4xf32> to vector<1x4xf32>
      %94 = vector.broadcast %93 : vector<1x4xf32> to vector<8x4xf32>
      %95 = vector.broadcast %cst_54 : f32 to vector<8x4xf32>
      %96 = arith.select %92, %94, %95 : vector<8x4xi1>, vector<8x4xf32>
      %cst_55 = arith.constant dense<0.000000e+00> : vector<8xf32>
      %97 = vector.multi_reduction <add>, %96, %cst_55 [1] : vector<8x4xf32> to vector<8xf32>
      %98 = vector.shape_cast %97 : vector<8xf32> to vector<8x1xf32>
      %c4_i32 = arith.constant 4 : i32
      %99 = vector.broadcast %c4_i32 : i32 to vector<8x1xi32>
      %100 = arith.cmpi slt, %73, %99 : vector<8x1xi32>
      %101 = arith.subf %70, %98 : vector<8x1xf32>
      %cst_56 = arith.constant 0.000000e+00 : f32
      %102 = vector.broadcast %cst_56 : f32 to vector<8x1xf32>
      %103 = arith.maximumf %101, %102 : vector<8x1xf32>
      %cst_57 = arith.constant 0.000000e+00 : f32
      %104 = vector.broadcast %cst_57 : f32 to vector<8x1xf32>
      %105 = arith.select %100, %103, %104 : vector<8x1xi1>, vector<8x1xf32>
      %106 = vector.shape_cast %105 : vector<8x1xf32> to vector<1x8x1xf32>
      %cst_58 = arith.constant dense<0.000000e+00> : vector<1xf32>
      %107 = vector.multi_reduction <add>, %106, %cst_58 [1, 2] : vector<1x8x1xf32> to vector<1xf32>
      %108 = vector.shape_cast %107 : vector<1xf32> to vector<1x1x1xf32>
      %109 = vector.extract %108[0, 0, 0] : f32 from vector<1x1x1xf32>
      %110 = vector.broadcast %109 : f32 to vector<1x1xf32>
      %111 = arith.addf %64, %110 : vector<1x1xf32>
      %c1_i32 = arith.constant 1 : i32
      %cst_59 = arith.constant 2.500000e-01 : f32
      %112 = vector.broadcast %cst_59 : f32 to vector<1x1xf32>
      %113 = arith.mulf %111, %112 : vector<1x1xf32>
      %cst_60 = arith.constant 1.000000e+00 : f32
      %114 = vector.broadcast %cst_60 : f32 to vector<1x1xf32>
      %115 = arith.mulf %114, %113 : vector<1x1xf32>
      %116 = vector.extract %115[0, 0] : f32 from vector<1x1xf32>
      %c0_61 = arith.constant 0 : index
      %c0_62 = arith.constant 0 : index
      %117 = memref.load %arg4[%c0_61, %c0_62] : memref<1x1xf32, #tpu.memory_space<smem>>
      memref.store %116, %arg4[%c0_61, %c0_62] : memref<1x1xf32, #tpu.memory_space<smem>>
    } else {
    }
    return
  }
  func.func @transform_0(%arg0: i32) -> (i32, i32, i32) {
    %c0_i32 = arith.constant 0 : i32
    %c0_i32_0 = arith.constant 0 : i32
    %c0_i32_1 = arith.constant 0 : i32
    return %c0_i32, %c0_i32_0, %arg0 : i32, i32, i32
  }
  func.func @transform_1(%arg0: i32) -> (i32, i32, i32) {
    %c0_i32 = arith.constant 0 : i32
    %c0_i32_0 = arith.constant 0 : i32
    %c0_i32_1 = arith.constant 0 : i32
    %c0_i32_2 = arith.constant 0 : i32
    return %c0_i32, %c0_i32_0, %c0_i32_1 : i32, i32, i32
  }
  func.func @transform_2(%arg0: i32) -> (i32, i32) {
    %c0_i32 = arith.constant 0 : i32
    %c0_i32_0 = arith.constant 0 : i32
    %c0_i32_1 = arith.constant 0 : i32
    return %c0_i32, %c0_i32_0 : i32, i32
  }
  func.func @transform_3(%arg0: i32) -> (i32, i32) {
    %c0_i32 = arith.constant 0 : i32
    %c0_i32_0 = arith.constant 0 : i32
    %c0_i32_1 = arith.constant 0 : i32
    return %c0_i32, %c0_i32_0 : i32, i32
  }
}

</mosaic_0001>

<bundles_post_ra>
// kernel: tpu_custom_call.1
= control target key start
LH: loop header
LB: loop body
LE: loop exit
PB: predicated region body
PF: predicated region fallthrough
CT: control target
= control target key end

     0   :  { %8 = vsyncpa [#allocation8], 0  ;;  %s443_s0 = inlined_call_operand.hbm [shape: f32[2,4,32], index: 0, kind: input, shape index: {}]   ;;  %s444_s1 = inlined_call_operand.hbm [shape: f32[2,4,16], index: 1, kind: input, shape index: {}]   ;;  %s445_s2 = inlined_call_operand.hbm [shape: f32[1,4], index: 2, kind: input, shape index: {}]   ;;  %s446_s3 = inlined_call_operand.hbm [shape: f32[1,1], index: 3, kind: output, shape index: {}]  }
   0x1   :  { %9 = vsyncpa [#allocation11], 0 }
   0x2   :  { %10 = vsyncpa [#allocation9], 0  ;;  %s336_s12 = smov [#allocation10]   ;;  %s337_s14 = smov [#allocation7]  }
   0x3   :  { %s28_s13 = sshll.u32 %s336_s12, 4  ;;  %s16_s15 = sshll.u32 %s337_s14, 4  ;;  %s29_s13 = int_to_ptr.vmem [resolvable:$true] %s28_s13  ;;  %s365_s15 = int_to_ptr.vmem [resolvable:$true] %s16_s15 }
   0x4   :  { %s254_s18 = scalar_lea.hbm %s444_s1, 128 }
   0x5   :  { %p255_p0 = scmp.ne.s32.totalorder %s444_s1, %s254_s18  ;;  %p258_p1 = scmp.lt.u32.totalorder %s254_s18, %s444_s1 }
   0x7   :  { %p260_p2 = pnand %p258_p1, %p255_p0 }
   0x9   :  { %263 = shalt.err (!%p260_p2)
}
   0xa   :  { %s264_s23 = scalar_lea.vmem %s29_s13, 128  ;;  %p269_p4 = scmp.lt.s32.totalorder %s29_s13, %s29_s13 }
   0xb   :  { %p265_p3 = scmp.ne.s32.totalorder %s29_s13, %s264_s23  ;;  %p270_p5 = scmp.lt.s32.totalorder %s264_s23, %s264_s23 }
   0xd   :  { %p271_p6 = por %p270_p5, %p269_p4 }
   0xf   :  { %p272_p7 = pnand %p271_p6, %p265_p3 }
  0x11   :  { %275 = shalt.err (!%p272_p7)
}
  0x12   :  { %s338_s24 = smov 64   ;;  %s339_s25 = smov 4  }
  0x13   :  { %34 = dma.hbm_to_vmem [thread:$0]  %s444_s1, 128, %s29_s13, [#allocation11], %s338_s24, %s338_s24, %s339_s25  }
  0x14   :  { %s276_s30 = scalar_lea.hbm %s443_s0, 128 }
  0x15   :  { %p277_p8 = scmp.ne.s32.totalorder %s443_s0, %s276_s30  ;;  %p280_p9 = scmp.lt.u32.totalorder %s276_s30, %s443_s0 }
  0x17   :  { %p282_p10 = pnand %p280_p9, %p277_p8 }
  0x19   :  { %285 = shalt.err (!%p282_p10)
}
  0x1a   :  { %s286_s8 = scalar_lea.vmem %s365_s15, 128  ;;  %p291_p12 = scmp.lt.s32.totalorder %s365_s15, %s365_s15 }
  0x1b   :  { %p287_p11 = scmp.ne.s32.totalorder %s365_s15, %s286_s8  ;;  %p292_p13 = scmp.lt.s32.totalorder %s286_s8, %s286_s8 }
  0x1d   :  { %p293_p0 = por %p292_p13, %p291_p12 }
  0x1f   :  { %p294_p1 = pnand %p293_p0, %p287_p11 }
  0x21   :  { %297 = shalt.err (!%p294_p1)
}
  0x22   :  { %22 = dma.hbm_to_vmem [thread:$0]  %s443_s0, 128, %s365_s15, [#allocation8], %s338_s24, %s338_s24, %s339_s25  }
  0x23   :  { %s340_s10 = smov [#allocation12]   ;;  %s298_s14 = scalar_lea.hbm %s445_s2, 16 }
  0x24   :  { %s41_s11 = sshll.u32 %s340_s10, 4  ;;  %p299_p2 = scmp.ne.s32.totalorder %s445_s2, %s298_s14  ;;  %s42_s11 = int_to_ptr.vmem [resolvable:$true] %s41_s11 }
  0x25   :  { %p302_p3 = scmp.lt.u32.totalorder %s298_s14, %s445_s2 }
  0x27   :  { %p304_p4 = pnand %p302_p3, %p299_p2 }
  0x29   :  { %307 = shalt.err (!%p304_p4)
}
  0x2a   :  { %s308_s20 = scalar_lea.vmem %s42_s11, 16  ;;  %s312_s0 = scalar_lea.vmem %s42_s11, 32 }
  0x2b   :  { %p309_p5 = scmp.ne.s32.totalorder %s42_s11, %s308_s20  ;;  %p313_p6 = scmp.lt.s32.totalorder %s42_s11, %s42_s11 }
  0x2c   :  { %p314_p7 = scmp.lt.s32.totalorder %s312_s0, %s308_s20 }
  0x2e   :  { %p315_p8 = por %p314_p7, %p313_p6 }
  0x30   :  { %p316_p9 = pnand %p315_p8, %p309_p5 }
  0x32   :  { %319 = shalt.err (!%p316_p9)
}
  0x33   :  { %44 = dma.hbm_to_vmem [thread:$0]  %s445_s2, 16, %s42_s11, [#allocation11]  }
  0x34   :  { %330 = dma.done.wait [#allocation8], 128  }
  0x35   :  { %331 = vsyncadd [#allocation8], 4294967168 }
  0x36   :  { %332 = dma.done.wait [#allocation11], 144  }
  0x37   :  { %333 = vsyncadd [#allocation11], 4294967152  ;;  %vm58_vm0 = vcmask 257024   ;;  %v341_v0 = vmov 0.0   ;;  %v62_v1 = vld [vmem:[#allocation7] sm:$0xf]  ;;  %v154_v34 = vlaneseq }
  0x38   :  { %60 = vst.msk [vmem:[#allocation3] sm:$0xf] %vm58_vm0, %v341_v0  ;;  %59 = vst.msk [vmem:[#allocation2] sm:$0xf] %vm58_vm0, %v341_v0  ;;  %v64_v2 = vld [vmem:[#allocation7 + $0x4] sm:$0xf]  ;;  %v71_v4 = vmul.f32 %v62_v1, %v62_v1 }
  0x39   :  { %61 = vst.msk [vmem:[#allocation4] sm:$0xf] %vm58_vm0, %v341_v0  ;;  %v75_v6 = vmul.f32 %v64_v2, %v64_v2  ;;  %v66_v8 = vmul.f32 %v64_v2, %v62_v1  ;;  %vm117_vm1 = vcmask 3072   ;;  %v342_v18 = vmov inf   ;;  %v97_v28 = vld [vmem:[#allocation10] sm:$0xf] }
  0x3a   :  { %120 = vst.msk [vmem:[#allocation5 + $0x4] sm:$0xf] %vm117_vm1, %v342_v18  ;;  %121 = vst.msk [vmem:[#allocation6 + $0x4] sm:$0xf] %vm117_vm1, %v341_v0  ;;  %v343_v19 = vmov 0   ;;  %vm101_vm2 = vcmask 125952   ;;  %v105_v32 = vmul.f32 %v97_v28, %v97_v28 }
  0x3b   :  { %248 = vset.pattern.permute.xlu1 %v343_v19  ;;  %v99_v29 = vld [vmem:[#allocation10 + $0x4] sm:$0xf]  ;;  %v160_v35 = vshrl.u32 %v154_v34, 7  ;;  %v155_v38 = vand.u32 127, %v154_v34  ;;  %vm179_vm7 = vcmask 31744   ;;  %vm199_vm11 = vcmask 7168  }
  0x3c   :  { %v100_v30 = vmul.f32 %v99_v29, %v97_v28  ;;  %v106_v33 = vsel %vm101_vm2, %v105_v32, 0.0  ;;  %v109_v41 = vmul.f32 %v99_v29, %v99_v29  ;;  %v232_v49 = vld [vmem:[#allocation12] ss:$0 sm:$0xff]  ;;  %s320_s25 = scalar_lea.hbm %s446_s3, 16 }
  0x3d   :  { %v165_v36 = vsub.s32 0, %v160_v35  ;;  %vm174_vm3 = vcmp.lt.s32.totalorder %v155_v38, %v160_v35  ;;  %vm195_vm10 = vcmp.lt.s32.totalorder %v160_v35, 4  ;;  %p321_p10 = scmp.ne.s32.totalorder %s446_s3, %s320_s25  ;;  %p324_p11 = scmp.lt.u32.totalorder %s320_s25, %s446_s3 }
  0x3e   :  { %v102_v31 = vsel %vm101_vm2, %v100_v30, 0.0  ;;  %v110_v44 = vsel %vm101_vm2, %v109_v41, 0.0 }
  0x3f   :  { %v70_v3 = vld [vmem:[#allocation3] sm:$0xf]  ;;  %v65_v7 = vld [vmem:[#allocation2] sm:$0xf]  ;;  %p326_p12 = pnand %p324_p11, %p321_p10 }
  0x40   :  { %v74_v5 = vld [vmem:[#allocation4] sm:$0xf]  ;;  %v72_v9 = vadd.f32 %v71_v4, %v70_v3  ;;  %v67_v11 = vadd.f32 %v66_v8, %v65_v7 }
  0x41   :  { %v76_v10 = vadd.f32 %v75_v6, %v74_v5 }
  0x42   :  { %73 = vst.msk [vmem:[#allocation3] sm:$0xf] %vm58_vm0, %v72_v9  ;;  %69 = vst.msk [vmem:[#allocation2] sm:$0xf] %vm58_vm0, %v67_v11 }
  0x43   :  { %77 = vst.msk [vmem:[#allocation4] sm:$0xf] %vm58_vm0, %v76_v10 }
  0x49   :  { %v85_v12 = vld [vmem:[#allocation3] sm:$0xf]  ;;  %v81_v14 = vld [vmem:[#allocation2] sm:$0xf] }
  0x4a   :  { %v89_v13 = vld [vmem:[#allocation4] sm:$0xf]  ;;  %v86_v15 = vsel %vm58_vm0, %v85_v12, 0.0  ;;  %v82_v16 = vsel %vm58_vm0, %v81_v14, 0.0 }
  0x4b   :  { %87 = vadd.xlane.f32.xlu0 %v86_v15  ;;  %83 = vadd.xlane.f32.xlu1 %v82_v16  ;;  %v90_v17 = vsel %vm58_vm0, %v89_v13, 0.0 }
  0x4f   :  { %91 = vadd.xlane.f32.xlu0 %v90_v17 }
  0xd8   :  { %v88_v20 = vpop.xlane.xlu0 %87  ;;  %v84_v24 = vpop.xlane.xlu1 %83 }
  0xdc   :  { %v92_v21 = vpop.xlane.xlu0 %91 }
  0xdd   :  { %v93_v22 = vmul.f32 %v92_v21, %v88_v20 }
  0xdf   :  { %v94_v23 = vmax.f32 %v93_v22, 1e-16 }
  0xe1   :  { %250 = vrsqrt.f32 %v94_v23 }
  0xeb   :  { %v251_v25 = vpop.eup %250 }
  0xec   :  { %v96_v26 = vmul.f32 %v251_v25, %v84_v24 }
  0xee   :  { %118 = vst.msk [vmem:[#allocation5] sm:$0xf] %vm117_vm1, %v96_v26  ;;  %122 = vxpose.xlu0.b32.start.end [1/1] (short) (narrow) %v96_v26, 8 }
  0xf5   :  { %v157_v27 = vld [vmem:[#allocation5] sm:$0xff] }
  0xf6   :  { %169 = vperm.xlu1 %248, %v157_v27  }
 0x117   :  { %249 = vset.pattern.permute.xlu0 %v343_v19 }
 0x11b   :  { %107 = vadd.xlane.f32.xlu0 %v106_v33 }
 0x16e   :  { %v138_v37 = vpop.trf.xlu0 }
 0x16f   :  { %v166_v39 = vrot.slane %v138_v37, %v165_v36 }
 0x175   :  { %v170_v40 = vpop.permute.xlu1 %169 }
 0x176   :  { %vm172_vm4 = vcmp.lt.f32.partialorder %v166_v39, %v170_v40  ;;  %vm173_vm5 = vcmp.eq.f32.partialorder %v166_v39, %v170_v40 }
 0x177   :  { %vm175_vm6 = vmand %vm173_vm5, %vm174_vm3 }
 0x178   :  { %vm176_vm8 = vmor %vm172_vm4, %vm175_vm6 }
 0x179   :  { %v231_v42 = vsel %vm176_vm8, 1.0, %v341_v0 }
 0x17a   :  { %v180_v43 = vsel %vm179_vm7, %v231_v42, 0.0 }
 0x17b   :  { %181 = vadd.xlane.f32.xlu1 %v180_v43 }
 0x17f   :  { %111 = vadd.xlane.f32.xlu1 %v110_v44 }
 0x183   :  { %103 = vadd.xlane.f32.xlu1 %v102_v31 }
 0x1a8   :  { %v108_v47 = vpop.xlane.xlu0 %107 }
 0x208   :  { %v182_v45 = vpop.xlane.xlu1 %181 }
 0x209   :  { %v233_v46 = vtrunc.f32 %v182_v45 }
 0x20b   :  { %v234_v48 = vcvt.f32.s32 %v233_v46 }
 0x20c   :  { %v112_v50 = vpop.xlane.xlu1 %111 }
 0x20d   :  { %vm184_vm9 = vcmp.eq.s32.totalorder %v155_v38, %v234_v48  ;;  %v113_v51 = vmul.f32 %v112_v50, %v108_v47 }
 0x20e   :  { %v191_v52 = vsel %vm184_vm9, %v232_v49, 0.0 }
 0x20f   :  { %v192_v53 = vsel %vm179_vm7, %v191_v52, 0.0  ;;  %v114_v54 = vmax.f32 %v113_v51, 1e-16 }
 0x210   :  { %193 = vadd.xlane.f32.xlu1 %v192_v53  ;;  %v104_v55 = vpop.xlane.xlu1 %103 }
 0x211   :  { %252 = vrsqrt.f32 %v114_v54 }
 0x21b   :  { %v253_v56 = vpop.eup %252 }
 0x21c   :  { %v116_v57 = vmul.f32 %v253_v56, %v104_v55 }
 0x21e   :  { %119 = vst.msk [vmem:[#allocation6] sm:$0xf] %vm117_vm1, %v116_v57 }
 0x225   :  { %v158_v58 = vld [vmem:[#allocation6] sm:$0xff] }
 0x29d   :  { %v194_v59 = vpop.xlane.xlu1 %193 }
 0x29e   :  { %v196_v60 = vsub.f32 %v158_v58, %v194_v59 }
 0x2a0   :  { %v197_v61 = vmax.f32 %v196_v60, 0.0 }
 0x2a2   :  { %v198_v62 = vsel %vm195_vm10, %v197_v61, 0.0 }
 0x2a3   :  { %v200_v63 = vsel %vm199_vm11, %v198_v62, 0.0 }
 0x2a4   :  { %201 = vadd.xlane.f32.xlu1 %v200_v63 }
 0x331   :  { %v202_v0 = vpop.xlane.xlu1 %201 }
 0x332   :  { %v203_v1 = vrot.slane %v202_v0, 4 }
 0x334   :  { %v204_v2 = vadd.f32 %v203_v1, %v202_v0 }
 0x336   :  { %v205_v3 = vrot.slane %v204_v2, 2 }
 0x338   :  { %v206_v4 = vadd.f32 %v205_v3, %v204_v2 }
 0x33a   :  { %v207_v5 = vrot.slane %v206_v4, 1 }
 0x33c   :  { %v208_v6 = vadd.f32 %v207_v5, %v206_v4 }
 0x33e   :  { %235 = vpush %v208_v6 }
 0x36f   :  { %s236_s2 = spop %235 }
 0x370   :  { %v210_v7 = vstv %s236_s2 }
 0x371   :  { %v212_v8 = vmul.f32 0.25, %v210_v7 }
 0x373   :  { %237 = vpush %v212_v8 }
 0x3a4   :  { %s238_s22 = spop %237 }
 0x3a5   :  { %215 = sst [smem:[#allocation13]] %s238_s22 }
 0x3a6   :  { %329 = shalt.err (!%p326_p12)
}
 0x3a7   :  { %s344_s30 = smov [#allocation13]  }
 0x3a8   :  { %223 = dma.smem_to_hbm %s344_s30, 16, %s446_s3, [#allocation9]  }
 0x3a9   :  { %334 = dma.done.wait [#allocation9], 16  }
 0x3aa   :  { %335 = vsyncadd [#allocation9], 4294967280 }
 0x3ab   :  { %227 = sfence }
 0x3ac   :  { %228 = vsyncpa [#allocation8], 1 }
 0x3ad   :  { %229 = vsyncpa [#allocation11], 1 }
 0x3ae   :  { %230 = vsyncpa [#allocation9], 1 }

</bundles_post_ra>
